<compile_context>
chip_gen: v6e
topology: v6e:2x2x1
jax: 0.10.0
libtpu: 0.0.40
codegen_flags: <defaults>
</compile_context>

<pallas_src>
import jax
import jax.numpy as jnp
from jax.experimental import pallas as pl
from jax.experimental.pallas import tpu as pltpu

N_CLASSES = 6
N_PAD = 128          # lane-dense padded fc4 output width
EPS = 1e-5
NEG_BIAS = -1e30     # padded logit lanes -> exp(z) == 0 in the softmax denom


def _round_up(n, m):
    return ((n + m - 1) // m) * m


def classifer18_kernel(x_ref, w2_ref, b2_ref, w3_ref, b3_ref, w4_ref, b4_ref, o_ref):
    # x tile: (TB, 1024) bf16.  BN (eval) is pre-folded into w/b.
    x = x_ref[...]

    # ---- fc2 + bn2 + ReLU  (1024 -> 256) --------------------------------
    h = jnp.dot(x, w2_ref[...], preferred_element_type=jnp.float32) + b2_ref[...]
    h = jnp.maximum(h, 0.0)
    # dropout2: identity in eval mode.

    # ---- fc3 + bn3 + ReLU  (256 -> 64) ----------------------------------
    h = jnp.dot(h.astype(jnp.bfloat16), w3_ref[...],
                preferred_element_type=jnp.float32) + b3_ref[...]
    h = jnp.maximum(h, 0.0)
    # dropout3: identity in eval mode.

    # ---- fc4 (64 -> 128 lane-padded) + log_softmax over dim=1 -----------
    # Padded columns have zero weights and bias = -1e30, so they are inert.
    logits = jnp.dot(h.astype(jnp.bfloat16), w4_ref[...],
                     preferred_element_type=jnp.float32) + b4_ref[...]
    z = logits - jnp.max(logits, axis=1, keepdims=True)
    # exp/log run on the EUP slot (otherwise idle here).
    o_ref[...] = z - jnp.log(jnp.sum(jnp.exp(z), axis=1, keepdims=True))


def fold_and_pack_params(p):
    """Fold eval-mode BatchNorm into the preceding Linear, pad fc4 to 128
    lanes, and cast MXU operands to bf16 (biases / accumulation stay f32)."""
    s2 = p["g2"] / jnp.sqrt(p["v2"] + EPS)                       # (1, 256)
    w2 = (p["w2"] * s2).astype(jnp.bfloat16)                     # (1024, 256)
    b2 = (p["b2"] - p["m2"]) * s2 + p["beta2"]                   # (1, 256) f32

    s3 = p["g3"] / jnp.sqrt(p["v3"] + EPS)                       # (1, 64)
    w3 = (p["w3"] * s3).astype(jnp.bfloat16)                     # (256, 64)
    b3 = (p["b3"] - p["m3"]) * s3 + p["beta3"]                   # (1, 64) f32

    w4 = jnp.zeros((64, N_PAD), jnp.float32)
    w4 = w4.at[:, :N_CLASSES].set(p["w4"]).astype(jnp.bfloat16)  # (64, 128)
    b4 = jnp.full((1, N_PAD), NEG_BIAS, jnp.float32)
    b4 = b4.at[:, :N_CLASSES].set(p["b4"])                       # (1, 128) f32
    return w2, b2, w3, b3, w4, b4


def classifer18_forward(x, params, *, tb=512):
    B = x.shape[0]
    # bf16 sublane packing -> batch tile must be a multiple of 16.
    TB = min(tb, _round_up(B, 16))
    Bp = _round_up(B, TB)

    xp = x if Bp == B else jnp.pad(x, ((0, Bp - B), (0, 0)))
    xp = xp.astype(jnp.bfloat16)

    w2, b2, w3, b3, w4, b4 = fold_and_pack_params(params)

    def const_spec(a):
        return pl.BlockSpec(a.shape, lambda i: (0, 0))

    weight_bytes = (w2.size + w3.size + w4.size) * 2 + (b2.size + b3.size + b4.size) * 4
    cost = pl.CostEstimate(
        flops=2 * Bp * (1024 * 256 + 256 * 64 + 64 * N_PAD),
        transcendentals=Bp * (N_PAD + 1),
        bytes_accessed=Bp * 1024 * 2 + weight_bytes + Bp * N_PAD * 4,
    )

    out = pl.pallas_call(
        classifer18_kernel,
        out_shape=jax.ShapeDtypeStruct((Bp, N_PAD), jnp.float32),
        grid=(Bp // TB,),
        in_specs=[
            pl.BlockSpec((TB, 1024), lambda i: (i, 0)),   # x: tiled over batch
            const_spec(w2), const_spec(b2),               # params: VMEM-resident
            const_spec(w3), const_spec(b3),
            const_spec(w4), const_spec(b4),
        ],
        out_specs=pl.BlockSpec((TB, N_PAD), lambda i: (i, 0)),
        compiler_params=pltpu.CompilerParams(
            dimension_semantics=("parallel",)),
        cost_estimate=cost,
    )(xp, w2, b2, w3, b3, w4, b4)

    # Drop batch padding and the 122 dead output lanes.
    return out[:B, :N_CLASSES]


def classifer18_reference(x, p):
    """Pure-JAX f32 reference (un-folded params) for correctness checking."""
    h = x @ p["w2"] + p["b2"]
    h = (h - p["m2"]) * (p["g2"] / jnp.sqrt(p["v2"] + EPS)) + p["beta2"]
    h = jnp.maximum(h, 0.0)
    h = h @ p["w3"] + p["b3"]
    h = (h - p["m3"]) * (p["g3"] / jnp.sqrt(p["v3"] + EPS)) + p["beta3"]
    h = jnp.maximum(h, 0.0)
    logits = h @ p["w4"] + p["b4"]
    return jax.nn.log_softmax(logits, axis=1)


def init_params(key):
    """Deterministic parameter init mirroring the PyTorch module's shapes."""
    ks = jax.random.split(key, 8)

    def kaiming_fan_out(k, shape_out_in):
        # kaiming_normal_(mode='fan_out', nonlinearity='relu'):
        # std = sqrt(2 / fan_out), torch weight shape is (out, in).
        out_f, in_f = shape_out_in
        std = jnp.sqrt(2.0 / out_f)
        w = jax.random.normal(k, (out_f, in_f), jnp.float32) * std
        return w.T  # store as (in, out) for x @ W

    def uniform_linear(kw, kb, out_f, in_f):
        # torch default Linear init: U(-1/sqrt(in), 1/sqrt(in))
        bound = 1.0 / jnp.sqrt(in_f)
        w = jax.random.uniform(kw, (out_f, in_f), jnp.float32, -bound, bound)
        b = jax.random.uniform(kb, (1, out_f), jnp.float32, -bound, bound)
        return w.T, b

    w4, b4 = uniform_linear(ks[2], ks[3], N_CLASSES, 64)

    return {
        "w2": kaiming_fan_out(ks[0], (256, 1024)),
        "b2": jnp.zeros((1, 256), jnp.float32),
        "g2": jnp.ones((1, 256), jnp.float32),
        "beta2": jnp.zeros((1, 256), jnp.float32),
        # non-trivial running stats so BN folding is exercised
        "m2": 0.1 * jax.random.normal(ks[4], (1, 256), jnp.float32),
        "v2": 1.0 + 0.1 * jax.random.uniform(ks[5], (1, 256), jnp.float32),
        "w3": kaiming_fan_out(ks[1], (64, 256)),
        "b3": jnp.zeros((1, 64), jnp.float32),
        "g3": jnp.ones((1, 64), jnp.float32),
        "beta3": jnp.zeros((1, 64), jnp.float32),
        "m3": 0.1 * jax.random.normal(ks[6], (1, 64), jnp.float32),
        "v3": 1.0 + 0.1 * jax.random.uniform(ks[7], (1, 64), jnp.float32),
        "w4": w4,
        "b4": b4,
    }


if __name__ == "__main__":
    key = jax.random.PRNGKey(0)
    k_x, k_p = jax.random.split(key)
    B = 16
    x = jax.random.normal(k_x, (B, 1024), jnp.float32)
    params = init_params(k_p)

    out = classifer18_forward(x, params)
    jax.block_until_ready(out)

    assert out.shape == (B, N_CLASSES)
    # log_softmax rows should sum (in prob space) to ~1
    probs_sum = jnp.sum(jnp.exp(out), axis=1)
    assert bool(jnp.all(jnp.abs(probs_sum - 1.0) < 1e-3))
    # agree with the pure-f32 reference up to bf16 MXU rounding
    ref = classifer18_reference(x, params)
    assert bool(jnp.max(jnp.abs(out - ref)) < 0.25)
    print("KERNEL_OK")
</pallas_src>

<mosaic_0001>
module attributes {stable_mosaic.version = 11 : i64} {
  func.func @classifer18_kernel(%arg0: i32, %arg1: memref<16x1024xbf16, #tpu.memory_space<vmem>>, %arg2: memref<1024x256xbf16, #tpu.memory_space<vmem>>, %arg3: memref<1x256xf32, #tpu.memory_space<vmem>>, %arg4: memref<256x64xbf16, #tpu.memory_space<vmem>>, %arg5: memref<1x64xf32, #tpu.memory_space<vmem>>, %arg6: memref<64x128xbf16, #tpu.memory_space<vmem>>, %arg7: memref<1x128xf32, #tpu.memory_space<vmem>>, %arg8: memref<16x128xf32, #tpu.memory_space<vmem>>) attributes {dimension_semantics = [#tpu.dimension_semantics<parallel>], iteration_bounds = array<i64: 1>, scalar_prefetch = 0 : i64, scratch_operands = 0 : i64, tpu.core_type = #tpu.core_type<tc>, window_params = [{transform_indices = @transform_0, window_bounds = array<i64: 16, 1024>}, {pipeline_mode = #tpu.pipeline_mode<synchronous>, transform_indices = @transform_1, window_bounds = array<i64: 1024, 256>}, {pipeline_mode = #tpu.pipeline_mode<synchronous>, transform_indices = @transform_2, window_bounds = array<i64: 1, 256>}, {pipeline_mode = #tpu.pipeline_mode<synchronous>, transform_indices = @transform_3, window_bounds = array<i64: 256, 64>}, {pipeline_mode = #tpu.pipeline_mode<synchronous>, transform_indices = @transform_4, window_bounds = array<i64: 1, 64>}, {pipeline_mode = #tpu.pipeline_mode<synchronous>, transform_indices = @transform_5, window_bounds = array<i64: 64, 128>}, {pipeline_mode = #tpu.pipeline_mode<synchronous>, transform_indices = @transform_6, window_bounds = array<i64: 1, 128>}, {transform_indices = @transform_7, window_bounds = array<i64: 16, 128>}]} {
    %c0 = arith.constant 0 : index
    %c0_0 = arith.constant 0 : index
    %0 = vector.load %arg1[%c0, %c0_0] : memref<16x1024xbf16, #tpu.memory_space<vmem>>, vector<16x1024xbf16>
    %c0_1 = arith.constant 0 : index
    %c0_2 = arith.constant 0 : index
    %1 = vector.load %arg2[%c0_1, %c0_2] : memref<1024x256xbf16, #tpu.memory_space<vmem>>, vector<1024x256xbf16>
    %cst = arith.constant dense<0.000000e+00> : vector<16x256xf32>
    %2 = tpu.matmul %0, %1, %cst {dimension_numbers = #tpu.dot_dimension_numbers<[1], [0], [0], [1], [0, 0, 1, 1], [], []>} : vector<16x1024xbf16>, vector<1024x256xbf16>, vector<16x256xf32> -> vector<16x256xf32>
    %c0_3 = arith.constant 0 : index
    %c0_4 = arith.constant 0 : index
    %3 = vector.load %arg3[%c0_3, %c0_4] : memref<1x256xf32, #tpu.memory_space<vmem>>, vector<1x256xf32>
    %4 = vector.broadcast %3 : vector<1x256xf32> to vector<16x256xf32>
    %5 = arith.addf %2, %4 : vector<16x256xf32>
    %cst_5 = arith.constant 0.000000e+00 : f32
    %6 = vector.broadcast %cst_5 : f32 to vector<16x256xf32>
    %7 = arith.maximumf %5, %6 : vector<16x256xf32>
    %8 = arith.truncf %7 : vector<16x256xf32> to vector<16x256xbf16>
    %c0_6 = arith.constant 0 : index
    %c0_7 = arith.constant 0 : index
    %9 = vector.load %arg4[%c0_6, %c0_7] : memref<256x64xbf16, #tpu.memory_space<vmem>>, vector<256x64xbf16>
    %cst_8 = arith.constant dense<0.000000e+00> : vector<16x64xf32>
    %10 = tpu.matmul %8, %9, %cst_8 {dimension_numbers = #tpu.dot_dimension_numbers<[1], [0], [0], [1], [0, 0, 1, 1], [], []>} : vector<16x256xbf16>, vector<256x64xbf16>, vector<16x64xf32> -> vector<16x64xf32>
    %c0_9 = arith.constant 0 : index
    %c0_10 = arith.constant 0 : index
    %11 = vector.load %arg5[%c0_9, %c0_10] : memref<1x64xf32, #tpu.memory_space<vmem>>, vector<1x64xf32>
    %12 = vector.broadcast %11 : vector<1x64xf32> to vector<16x64xf32>
    %13 = arith.addf %10, %12 : vector<16x64xf32>
    %cst_11 = arith.constant 0.000000e+00 : f32
    %14 = vector.broadcast %cst_11 : f32 to vector<16x64xf32>
    %15 = arith.maximumf %13, %14 : vector<16x64xf32>
    %16 = arith.truncf %15 : vector<16x64xf32> to vector<16x64xbf16>
    %c0_12 = arith.constant 0 : index
    %c0_13 = arith.constant 0 : index
    %17 = vector.load %arg6[%c0_12, %c0_13] : memref<64x128xbf16, #tpu.memory_space<vmem>>, vector<64x128xbf16>
    %cst_14 = arith.constant dense<0.000000e+00> : vector<16x128xf32>
    %18 = tpu.matmul %16, %17, %cst_14 {dimension_numbers = #tpu.dot_dimension_numbers<[1], [0], [0], [1], [0, 0, 1, 1], [], []>} : vector<16x64xbf16>, vector<64x128xbf16>, vector<16x128xf32> -> vector<16x128xf32>
    %c0_15 = arith.constant 0 : index
    %c0_16 = arith.constant 0 : index
    %19 = vector.load %arg7[%c0_15, %c0_16] : memref<1x128xf32, #tpu.memory_space<vmem>>, vector<1x128xf32>
    %20 = vector.broadcast %19 : vector<1x128xf32> to vector<16x128xf32>
    %21 = arith.addf %18, %20 : vector<16x128xf32>
    %cst_17 = arith.constant dense<0xFF800000> : vector<16xf32>
    %22 = vector.multi_reduction <maximumf>, %21, %cst_17 [1] : vector<16x128xf32> to vector<16xf32>
    %23 = vector.shape_cast %22 : vector<16xf32> to vector<16x1xf32>
    %24 = vector.broadcast %23 : vector<16x1xf32> to vector<16x128xf32>
    %25 = arith.subf %21, %24 : vector<16x128xf32>
    %26 = math.exp %25 : vector<16x128xf32>
    %cst_18 = arith.constant dense<0.000000e+00> : vector<16xf32>
    %27 = vector.multi_reduction <add>, %26, %cst_18 [1] : vector<16x128xf32> to vector<16xf32>
    %28 = vector.shape_cast %27 : vector<16xf32> to vector<16x1xf32>
    %29 = math.log %28 : vector<16x1xf32>
    %30 = vector.broadcast %29 : vector<16x1xf32> to vector<16x128xf32>
    %31 = arith.subf %25, %30 : vector<16x128xf32>
    %c0_19 = arith.constant 0 : index
    %c0_20 = arith.constant 0 : index
    %32 = vector.load %arg8[%c0_19, %c0_20] : memref<16x128xf32, #tpu.memory_space<vmem>>, vector<16x128xf32>
    tpu.vector_store %arg8[%c0_19, %c0_20], %31 {strides = array<i32>} : memref<16x128xf32, #tpu.memory_space<vmem>>, vector<16x128xf32>,
    return
  }
  func.func @transform_0(%arg0: i32) -> (i32, i32) {
    %c0_i32 = arith.constant 0 : i32
    %c0_i32_0 = arith.constant 0 : i32
    return %arg0, %c0_i32 : i32, i32
  }
  func.func @transform_1(%arg0: i32) -> (i32, i32) {
    %c0_i32 = arith.constant 0 : i32
    %c0_i32_0 = arith.constant 0 : i32
    %c0_i32_1 = arith.constant 0 : i32
    return %c0_i32, %c0_i32_0 : i32, i32
  }
  func.func @transform_2(%arg0: i32) -> (i32, i32) {
    %c0_i32 = arith.constant 0 : i32
    %c0_i32_0 = arith.constant 0 : i32
    %c0_i32_1 = arith.constant 0 : i32
    return %c0_i32, %c0_i32_0 : i32, i32
  }
  func.func @transform_3(%arg0: i32) -> (i32, i32) {
    %c0_i32 = arith.constant 0 : i32
    %c0_i32_0 = arith.constant 0 : i32
    %c0_i32_1 = arith.constant 0 : i32
    return %c0_i32, %c0_i32_0 : i32, i32
  }
  func.func @transform_4(%arg0: i32) -> (i32, i32) {
    %c0_i32 = arith.constant 0 : i32
    %c0_i32_0 = arith.constant 0 : i32
    %c0_i32_1 = arith.constant 0 : i32
    return %c0_i32, %c0_i32_0 : i32, i32
  }
  func.func @transform_5(%arg0: i32) -> (i32, i32) {
    %c0_i32 = arith.constant 0 : i32
    %c0_i32_0 = arith.constant 0 : i32
    %c0_i32_1 = arith.constant 0 : i32
    return %c0_i32, %c0_i32_0 : i32, i32
  }
  func.func @transform_6(%arg0: i32) -> (i32, i32) {
    %c0_i32 = arith.constant 0 : i32
    %c0_i32_0 = arith.constant 0 : i32
    %c0_i32_1 = arith.constant 0 : i32
    return %c0_i32, %c0_i32_0 : i32, i32
  }
  func.func @transform_7(%arg0: i32) -> (i32, i32) {
    %c0_i32 = arith.constant 0 : i32
    %c0_i32_0 = arith.constant 0 : i32
    return %arg0, %c0_i32 : i32, i32
  }
}

</mosaic_0001>

<bundles_post_ra>
// kernel: tpu_custom_call.1
= control target key start
LH: loop header
LB: loop body
LE: loop exit
PB: predicated region body
PF: predicated region fallthrough
CT: control target
= control target key end

     0   :  { %12 = vsyncpa [#allocation3], 0  ;;  %s1985_s0 = inlined_call_operand.vmem [shape: bf16[16,1024], index: 0, kind: input, shape index: {}]   ;;  %s1986_s1 = inlined_call_operand.hbm [shape: bf16[1024,256], index: 1, kind: input, shape index: {}]   ;;  %s1987_s2 = inlined_call_operand.vmem [shape: f32[1,256], index: 2, kind: input, shape index: {}]   ;;  %s1988_s3 = inlined_call_operand.vmem [shape: bf16[256,64], index: 3, kind: input, shape index: {}]   ;;  %s1989_s4 = inlined_call_operand.vmem [shape: f32[1,64], index: 4, kind: input, shape index: {}]   ;;  %s1990_s5 = inlined_call_operand.vmem [shape: bf16[64,128], index: 5, kind: input, shape index: {}]   ;;  %s1991_s6 = inlined_call_operand.vmem [shape: f32[1,128], index: 6, kind: input, shape index: {}]   ;;  %s1992_s7 = inlined_call_operand.hbm [shape: f32[16,128], index: 7, kind: output, shape index: {}]  }
   0x1   :  { %13 = vsyncpa [#allocation4], 0  ;;  %s1818_s24 = smov [#allocation2]  }
   0x2   :  { %s21_s25 = sshll.u32 %s1818_s24, 4  ;;  %s22_s25 = int_to_ptr.vmem [resolvable:$true] %s21_s25 }
   0x3   :  { %s1782_s26 = scalar_lea.vmem %s22_s25, 16384  ;;  %p1787_p1 = scmp.lt.s32.totalorder %s22_s25, %s22_s25 }
   0x4   :  { %p1783_p0 = scmp.ne.s32.totalorder %s22_s25, %s1782_s26  ;;  %p1788_p2 = scmp.lt.s32.totalorder %s1782_s26, %s1782_s26 }
   0x6   :  { %p1789_p3 = por %p1788_p2, %p1787_p1 }
   0x8   :  { %p1790_p4 = pnand %p1789_p3, %p1783_p0 }
   0xa   :  { %1793 = shalt.err (!%p1790_p4)
}
   0xb   :  { %s1819_s27 = smov 128   ;;  %s1820_s28 = smov 8  }
   0xc   :  { %27 = dma.hbm_to_vmem [thread:$0]  %s1986_s1, 16384, %s22_s25, [#allocation3], %s1819_s27, %s1819_s27, %s1820_s28  }
   0xd   :  { %1814 = dma.done.wait [#allocation3], 16384  }
   0xe   :  { %1815 = vsyncadd [#allocation3], 4294950912  ;;  %v1554_v0 = vld [vmem:[#allocation2 + $0x74] ss:$8 sps:$4 sm:$0xff]   ;;  %v1558_v2 = vld [vmem:[#allocation2 + $0x70] ss:$8 sps:$4 sm:$0xff]  }
   0xf   :  { %v1556_v1 = vld [vmem:[#allocation2 + $0x174] ss:$8 sps:$4 sm:$0xff]   ;;  %870 = vmatprep.subr.bf16.mxu0 %v1554_v0  ;;  %v1559_v3 = vld [vmem:[#allocation2 + $0x170] ss:$8 sps:$4 sm:$0xff]   ;;  %v1560_v4 = vld [vmem:[#allocation2 + $0x64] ss:$8 sps:$4 sm:$0xff]  }
  0x10   :  { %913 = vmatprep.subr.bf16.mxu1 %v1556_v1  ;;  %871 = vmatpush1.bf16.msra.mxu0 %v1558_v2  ;;  %v1562_v5 = vld [vmem:[#allocation2 + $0x164] ss:$8 sps:$4 sm:$0xff]   ;;  %v1564_v6 = vld [vmem:[#allocation2 + $0x60] ss:$8 sps:$4 sm:$0xff]   ;;  %v1566_v8 = vld [vmem:[#allocation2 + $0x54] ss:$8 sps:$4 sm:$0xff]  }
  0x11   :  { %914 = vmatpush1.bf16.msra.mxu1 %v1559_v3  ;;  %872 = vmatprep.subr.bf16.mxu0 %v1560_v4  ;;  %v1565_v7 = vld [vmem:[#allocation2 + $0x160] ss:$8 sps:$4 sm:$0xff]   ;;  %v1568_v9 = vld [vmem:[#allocation2 + $0x154] ss:$8 sps:$4 sm:$0xff]   ;;  %v1570_v10 = vld [vmem:[#allocation2 + $0x50] ss:$8 sps:$4 sm:$0xff]  }
  0x12   :  { %915 = vmatprep.subr.bf16.mxu1 %v1562_v5  ;;  %v1571_v11 = vld [vmem:[#allocation2 + $0x150] ss:$8 sps:$4 sm:$0xff]   ;;  %v1572_v12 = vld [vmem:[#allocation2 + $0x44] ss:$8 sps:$4 sm:$0xff]   ;;  %v1576_v14 = vld [vmem:[#allocation2 + $0x40] ss:$8 sps:$4 sm:$0xff]  }
  0x13   :  { %v1574_v13 = vld [vmem:[#allocation2 + $0x144] ss:$8 sps:$4 sm:$0xff]   ;;  %v1577_v15 = vld [vmem:[#allocation2 + $0x140] ss:$8 sps:$4 sm:$0xff]   ;;  %v1578_v16 = vld [vmem:[#allocation2 + $0x34] ss:$8 sps:$4 sm:$0xff]  }
  0x14   :  { %873 = vmatpush1.bf16.msra.mxu0 %v1564_v6  ;;  %v1580_v17 = vld [vmem:[#allocation2 + $0x134] ss:$8 sps:$4 sm:$0xff]   ;;  %v1582_v18 = vld [vmem:[#allocation2 + $0x30] ss:$8 sps:$4 sm:$0xff]   ;;  %v1584_v20 = vld [vmem:[#allocation2 + $0x24] ss:$8 sps:$4 sm:$0xff]  }
  0x15   :  { %916 = vmatpush1.bf16.msra.mxu1 %v1565_v7  ;;  %874 = vmatprep.subr.bf16.mxu0 %v1566_v8  ;;  %v1583_v19 = vld [vmem:[#allocation2 + $0x130] ss:$8 sps:$4 sm:$0xff]   ;;  %v1586_v21 = vld [vmem:[#allocation2 + $0x124] ss:$8 sps:$4 sm:$0xff]   ;;  %v1588_v22 = vld [vmem:[#allocation2 + $0x20] ss:$8 sps:$4 sm:$0xff]  }
  0x16   :  { %917 = vmatprep.subr.bf16.mxu1 %v1568_v9  ;;  %v1589_v23 = vld [vmem:[#allocation2 + $0x120] ss:$8 sps:$4 sm:$0xff]   ;;  %v1590_v24 = vld [vmem:[#allocation2 + $0x14] ss:$8 sps:$4 sm:$0xff]   ;;  %v1594_v26 = vld [vmem:[#allocation2 + $0x10] ss:$8 sps:$4 sm:$0xff]  }
  0x17   :  { %v1592_v25 = vld [vmem:[#allocation2 + $0x114] ss:$8 sps:$4 sm:$0xff]   ;;  %v1595_v27 = vld [vmem:[#allocation2 + $0x110] ss:$8 sps:$4 sm:$0xff]   ;;  %v1596_v28 = vld [vmem:[#allocation2 + $0x4] ss:$8 sps:$4 sm:$0xff]  }
  0x18   :  { %875 = vmatpush1.bf16.msra.mxu0 %v1570_v10  ;;  %v1598_v29 = vld [vmem:[#allocation2 + $0x104] ss:$8 sps:$4 sm:$0xff]   ;;  %v1600_v30 = vld [vmem:[#allocation2] ss:$8 sps:$4 sm:$0xff]   ;;  %v1602_v32 = vld [vmem:[#allocation2 + $0xf4] ss:$8 sps:$4 sm:$0xff]  }
  0x19   :  { %918 = vmatpush1.bf16.msra.mxu1 %v1571_v11  ;;  %876 = vmatprep.subr.bf16.mxu0 %v1572_v12  ;;  %v1601_v31 = vld [vmem:[#allocation2 + $0x100] ss:$8 sps:$4 sm:$0xff]   ;;  %v1604_v33 = vld [vmem:[#allocation2 + $0x1f4] ss:$8 sps:$4 sm:$0xff]   ;;  %v1606_v34 = vld [vmem:[#allocation2 + $0xf0] ss:$8 sps:$4 sm:$0xff]  }
  0x1a   :  { %919 = vmatprep.subr.bf16.mxu1 %v1574_v13  ;;  %v1607_v35 = vld [vmem:[#allocation2 + $0x1f0] ss:$8 sps:$4 sm:$0xff]   ;;  %v1608_v36 = vld [vmem:[#allocation2 + $0xe4] ss:$8 sps:$4 sm:$0xff]   ;;  %v1612_v38 = vld [vmem:[#allocation2 + $0xe0] ss:$8 sps:$4 sm:$0xff]  }
  0x1b   :  { %v1610_v37 = vld [vmem:[#allocation2 + $0x1e4] ss:$8 sps:$4 sm:$0xff]   ;;  %v1613_v39 = vld [vmem:[#allocation2 + $0x1e0] ss:$8 sps:$4 sm:$0xff]   ;;  %v1614_v40 = vld [vmem:[#allocation2 + $0xd4] ss:$8 sps:$4 sm:$0xff]  }
  0x1c   :  { %877 = vmatpush1.bf16.msra.mxu0 %v1576_v14  ;;  %v1616_v41 = vld [vmem:[#allocation2 + $0x1d4] ss:$8 sps:$4 sm:$0xff]   ;;  %v1618_v42 = vld [vmem:[#allocation2 + $0xd0] ss:$8 sps:$4 sm:$0xff]   ;;  %v1620_v44 = vld [vmem:[#allocation2 + $0xc4] ss:$8 sps:$4 sm:$0xff]  }
  0x1d   :  { %920 = vmatpush1.bf16.msra.mxu1 %v1577_v15  ;;  %878 = vmatprep.subr.bf16.mxu0 %v1578_v16  ;;  %v1619_v43 = vld [vmem:[#allocation2 + $0x1d0] ss:$8 sps:$4 sm:$0xff]   ;;  %v1622_v45 = vld [vmem:[#allocation2 + $0x1c4] ss:$8 sps:$4 sm:$0xff]   ;;  %v1624_v46 = vld [vmem:[#allocation2 + $0xc0] ss:$8 sps:$4 sm:$0xff]  }
  0x1e   :  { %921 = vmatprep.subr.bf16.mxu1 %v1580_v17  ;;  %v1625_v47 = vld [vmem:[#allocation2 + $0x1c0] ss:$8 sps:$4 sm:$0xff]   ;;  %v1626_v52 = vld [vmem:[#allocation2 + $0xb4] ss:$8 sps:$4 sm:$0xff]   ;;  %v1630_v56 = vld [vmem:[#allocation2 + $0xb0] ss:$8 sps:$4 sm:$0xff]  }
  0x1f   :  { %v42_v48 = vld [vmem:[%s1985_s0] sm:$0xff]  ;;  %v43_v50 = vld [vmem:[%s1985_s0 + $0x8] sm:$0xff]  ;;  %v1628_v54 = vld [vmem:[#allocation2 + $0x1b4] ss:$8 sps:$4 sm:$0xff]   ;;  %vm1822_vm0 = vmmov 0   ;;  %vm1266_vm1 = vcmask 523264  }
  0x20   :  { %879 = vmatpush1.bf16.msra.mxu0 %v1582_v18  ;;  %v46_v49 = vld [vmem:[%s1985_s0 + $0x20] sm:$0xff]  ;;  %v47_v51 = vld [vmem:[%s1985_s0 + $0x28] sm:$0xff]  ;;  %v1631_v57 = vld [vmem:[#allocation2 + $0x1b0] ss:$8 sps:$4 sm:$0xff]  }
  0x21   :  { %922 = vmatpush1.bf16.msra.mxu1 %v1583_v19  ;;  %880 = vmatprep.subr.bf16.mxu0 %v1584_v20  ;;  %v1351_v53 = vcombine.high %v42_v48, %v46_v49  ;;  %v1353_v55 = vcombine.high %v43_v50, %v47_v51  ;;  %v1632_v58 = vld [vmem:[#allocation2 + $0xa4] ss:$8 sps:$4 sm:$0xff]   ;;  %v1636_v60 = vld [vmem:[#allocation2 + $0xa0] ss:$8 sps:$4 sm:$0xff]   ;;  %v1638_v62 = vld [vmem:[#allocation2 + $0x94] ss:$8 sps:$4 sm:$0xff]   ;;  %v1350_v8 = vcombine.low %v42_v48, %v46_v49 }
  0x22   :  { %923 = vmatprep.subr.bf16.mxu1 %v1586_v21  ;;  %v1634_v59 = vld [vmem:[#allocation2 + $0x1a4] ss:$8 sps:$4 sm:$0xff]   ;;  %v1637_v61 = vld [vmem:[#allocation2 + $0x1a0] ss:$8 sps:$4 sm:$0xff]   ;;  %v1640_v63 = vld [vmem:[#allocation2 + $0x194] ss:$8 sps:$4 sm:$0xff]   ;;  %v1352_v9 = vcombine.low %v43_v50, %v47_v51 }
  0x23   :  { %902 = vmatprep.mubr.bf16.mxu0 %v1351_v53  ;;  %945 = vmatprep.mubr.bf16.mxu1 %v1353_v55  ;;  %v1642_v0 = vld [vmem:[#allocation2 + $0x90] ss:$8 sps:$4 sm:$0xff]   ;;  %v1644_v2 = vld [vmem:[#allocation2 + $0x84] ss:$8 sps:$4 sm:$0xff]   ;;  %v1648_v4 = vld [vmem:[#allocation2 + $0x80] ss:$8 sps:$4 sm:$0xff]  }
  0x24   :  { %881 = vmatpush1.bf16.msra.mxu0 %v1588_v22  ;;  %v1643_v1 = vld [vmem:[#allocation2 + $0x190] ss:$8 sps:$4 sm:$0xff]   ;;  %v1646_v3 = vld [vmem:[#allocation2 + $0x184] ss:$8 sps:$4 sm:$0xff]   ;;  %v1649_v5 = vld [vmem:[#allocation2 + $0x180] ss:$8 sps:$4 sm:$0xff]  }
  0x25   :  { %924 = vmatpush1.bf16.msra.mxu1 %v1589_v23  ;;  %882 = vmatprep.subr.bf16.mxu0 %v1590_v24  ;;  %v1652_v6 = vld [vmem:[#allocation2 + $0x274] ss:$8 sps:$4 sm:$0xff]   ;;  %v1650_v10 = vld [vmem:[#allocation2 + $0x270] ss:$8 sps:$4 sm:$0xff]   ;;  %v1658_v12 = vld [vmem:[#allocation2 + $0x264] ss:$8 sps:$4 sm:$0xff]  }
  0x26   :  { %925 = vmatprep.subr.bf16.mxu1 %v1592_v25  ;;  %v1655_v7 = vld [vmem:[#allocation2 + $0x374] ss:$8 sps:$4 sm:$0xff]   ;;  %v1653_v11 = vld [vmem:[#allocation2 + $0x370] ss:$8 sps:$4 sm:$0xff]   ;;  %v1661_v13 = vld [vmem:[#allocation2 + $0x364] ss:$8 sps:$4 sm:$0xff]  }
  0x27   :  { %v1656_v14 = vld [vmem:[#allocation2 + $0x260] ss:$8 sps:$4 sm:$0xff]   ;;  %v1664_v16 = vld [vmem:[#allocation2 + $0x254] ss:$8 sps:$4 sm:$0xff]   ;;  %v1662_v18 = vld [vmem:[#allocation2 + $0x250] ss:$8 sps:$4 sm:$0xff]  }
  0x28   :  { %883 = vmatpush1.bf16.msra.mxu0 %v1594_v26  ;;  %v1659_v15 = vld [vmem:[#allocation2 + $0x360] ss:$8 sps:$4 sm:$0xff]   ;;  %v1667_v17 = vld [vmem:[#allocation2 + $0x354] ss:$8 sps:$4 sm:$0xff]   ;;  %v1665_v19 = vld [vmem:[#allocation2 + $0x350] ss:$8 sps:$4 sm:$0xff]  }
  0x29   :  { %926 = vmatpush1.bf16.msra.mxu1 %v1595_v27  ;;  %884 = vmatprep.subr.bf16.mxu0 %v1596_v28  ;;  %v1670_v20 = vld [vmem:[#allocation2 + $0x244] ss:$8 sps:$4 sm:$0xff]   ;;  %v1668_v22 = vld [vmem:[#allocation2 + $0x240] ss:$8 sps:$4 sm:$0xff]   ;;  %v1676_v24 = vld [vmem:[#allocation2 + $0x234] ss:$8 sps:$4 sm:$0xff]  }
  0x2a   :  { %927 = vmatprep.subr.bf16.mxu1 %v1598_v29  ;;  %v1673_v21 = vld [vmem:[#allocation2 + $0x344] ss:$8 sps:$4 sm:$0xff]   ;;  %v1671_v23 = vld [vmem:[#allocation2 + $0x340] ss:$8 sps:$4 sm:$0xff]   ;;  %v1679_v25 = vld [vmem:[#allocation2 + $0x334] ss:$8 sps:$4 sm:$0xff]  }
  0x2b   :  { %v1674_v26 = vld [vmem:[#allocation2 + $0x230] ss:$8 sps:$4 sm:$0xff]   ;;  %v1682_v28 = vld [vmem:[#allocation2 + $0x224] ss:$8 sps:$4 sm:$0xff]   ;;  %v1707_v53 = vld [vmem:[#allocation2 + $0x3e0] ss:$8 sps:$4 sm:$0xff]  }
  0x2c   :  { %885 = vmatpush1.bf16.msra.mxu0 %v1600_v30  ;;  %v1677_v27 = vld [vmem:[#allocation2 + $0x330] ss:$8 sps:$4 sm:$0xff]   ;;  %v1685_v29 = vld [vmem:[#allocation2 + $0x324] ss:$8 sps:$4 sm:$0xff]   ;;  %v1680_v30 = vld [vmem:[#allocation2 + $0x220] ss:$8 sps:$4 sm:$0xff]  }
  0x2d   :  { %928 = vmatpush1.bf16.msra.mxu1 %v1601_v31  ;;  %886 = vmatprep.subr.bf16.mxu0 %v1602_v32  ;;  %v1683_v31 = vld [vmem:[#allocation2 + $0x320] ss:$8 sps:$4 sm:$0xff]   ;;  %v1688_v32 = vld [vmem:[#allocation2 + $0x214] ss:$8 sps:$4 sm:$0xff]   ;;  %v1698_v48 = vld [vmem:[#allocation2 + $0x2f0] ss:$8 sps:$4 sm:$0xff]  }
  0x2e   :  { %929 = vmatprep.subr.bf16.mxu1 %v1604_v33  ;;  %v1691_v33 = vld [vmem:[#allocation2 + $0x314] ss:$8 sps:$4 sm:$0xff]   ;;  %v1701_v49 = vld [vmem:[#allocation2 + $0x3f0] ss:$8 sps:$4 sm:$0xff]   ;;  %v1706_v50 = vld [vmem:[#allocation2 + $0x2e4] ss:$8 sps:$4 sm:$0xff]  }
  0x2f   :  { %v1709_v51 = vld [vmem:[#allocation2 + $0x3e4] ss:$8 sps:$4 sm:$0xff]   ;;  %v1715_v55 = vld [vmem:[#allocation2 + $0x3d4] ss:$8 sps:$4 sm:$0xff]  }
  0x30   :  { %887 = vmatpush2.bf16.msra.mxu0 %v1606_v34  ;;  %v1686_v34 = vld [vmem:[#allocation2 + $0x210] ss:$8 sps:$4 sm:$0xff]  }
  0x31   :  { %930 = vmatpush2.bf16.msra.mxu1 %v1607_v35  ;;  %888 = vmatprep.subr.bf16.mxu0 %v1608_v36  ;;  %v1689_v35 = vld [vmem:[#allocation2 + $0x310] ss:$8 sps:$4 sm:$0xff]  }
  0x32   :  { %931 = vmatprep.subr.bf16.mxu1 %v1610_v37  ;;  %v1885_v36 = vld [vmem:[%s1985_s0 + $0x10] sm:$0xff]  ;;  %v1694_v37 = vld [vmem:[#allocation2 + $0x204] ss:$8 sps:$4 sm:$0xff]  }
  0x34   :  { %889 = vmatpush2.bf16.msra.mxu0 %v1612_v38  ;;  %v1890_v38 = vld [vmem:[%s1985_s0 + $0x30] sm:$0xff] }
  0x35   :  { %932 = vmatpush2.bf16.msra.mxu1 %v1613_v39  ;;  %890 = vmatprep.subr.bf16.mxu0 %v1614_v40  ;;  %v1895_v39 = vld [vmem:[%s1985_s0 + $0x18] sm:$0xff] }
  0x36   :  { %933 = vmatprep.subr.bf16.mxu1 %v1616_v41  ;;  %v1900_v40 = vld [vmem:[%s1985_s0 + $0x38] sm:$0xff]  ;;  %v1697_v41 = vld [vmem:[#allocation2 + $0x304] ss:$8 sps:$4 sm:$0xff]  }
  0x38   :  { %891 = vmatpush2.bf16.msra.mxu0 %v1618_v42  ;;  %v1355_v42 = vcombine.high %v1885_v36, %v1890_v38 }
  0x39   :  { %934 = vmatpush2.bf16.msra.mxu1 %v1619_v43  ;;  %892 = vmatprep.subr.bf16.mxu0 %v1620_v44  ;;  %v1357_v43 = vcombine.high %v1895_v39, %v1900_v40  ;;  %v1692_v44 = vld [vmem:[#allocation2 + $0x200] ss:$8 sps:$4 sm:$0xff]  }
  0x3a   :  { %935 = vmatprep.subr.bf16.mxu1 %v1622_v45  ;;  %v1695_v45 = vld [vmem:[#allocation2 + $0x300] ss:$8 sps:$4 sm:$0xff]  }
  0x3c   :  { %893 = vmatpush2.bf16.msra.mxu0 %v1624_v46  ;;  %v1700_v46 = vld [vmem:[#allocation2 + $0x2f4] ss:$8 sps:$4 sm:$0xff]  }
  0x3d   :  { %936 = vmatpush2.bf16.msra.mxu1 %v1625_v47  ;;  %894 = vmatprep.subr.bf16.mxu0 %v1626_v52  ;;  %v1703_v47 = vld [vmem:[#allocation2 + $0x3f4] ss:$8 sps:$4 sm:$0xff]   ;;  %v1704_v52 = vld [vmem:[#allocation2 + $0x2e0] ss:$8 sps:$4 sm:$0xff]  }
  0x3e   :  { %937 = vmatprep.subr.bf16.mxu1 %v1628_v54  ;;  %v1712_v54 = vld [vmem:[#allocation2 + $0x2d4] ss:$8 sps:$4 sm:$0xff]  }
  0x40   :  { %895 = vmatpush2.bf16.msra.mxu0 %v1630_v56  ;;  %v1710_v56 = vld [vmem:[#allocation2 + $0x2d0] ss:$8 sps:$4 sm:$0xff]  }
  0x41   :  { %938 = vmatpush2.bf16.msra.mxu1 %v1631_v57  ;;  %896 = vmatprep.subr.bf16.mxu0 %v1632_v58  ;;  %v1713_v57 = vld [vmem:[#allocation2 + $0x3d0] ss:$8 sps:$4 sm:$0xff]   ;;  %v1718_v58 = vld [vmem:[#allocation2 + $0x2c4] ss:$8 sps:$4 sm:$0xff]  }
  0x42   :  { %939 = vmatprep.subr.bf16.mxu1 %v1634_v59  ;;  %v1721_v59 = vld [vmem:[#allocation2 + $0x3c4] ss:$8 sps:$4 sm:$0xff]  }
  0x44   :  { %897 = vmatpush2.bf16.msra.mxu0 %v1636_v60  ;;  %v1716_v60 = vld [vmem:[#allocation2 + $0x2c0] ss:$8 sps:$4 sm:$0xff]  }
  0x45   :  { %940 = vmatpush2.bf16.msra.mxu1 %v1637_v61  ;;  %898 = vmatprep.subr.bf16.mxu0 %v1638_v62  ;;  %v1719_v61 = vld [vmem:[#allocation2 + $0x3c0] ss:$8 sps:$4 sm:$0xff]   ;;  %v1724_v62 = vld [vmem:[#allocation2 + $0x2b4] ss:$8 sps:$4 sm:$0xff]  }
  0x46   :  { %941 = vmatprep.subr.bf16.mxu1 %v1640_v63  ;;  %v1727_v63 = vld [vmem:[#allocation2 + $0x3b4] ss:$8 sps:$4 sm:$0xff]  }
  0x48   :  { %899 = vmatpush2.bf16.msra.mxu0 %v1642_v0  ;;  %v1722_v0 = vld [vmem:[#allocation2 + $0x2b0] ss:$8 sps:$4 sm:$0xff]  }
  0x49   :  { %942 = vmatpush2.bf16.msra.mxu1 %v1643_v1  ;;  %900 = vmatprep.subr.bf16.mxu0 %v1644_v2  ;;  %v1725_v1 = vld [vmem:[#allocation2 + $0x3b0] ss:$8 sps:$4 sm:$0xff]   ;;  %v1730_v2 = vld [vmem:[#allocation2 + $0x2a4] ss:$8 sps:$4 sm:$0xff]  }
  0x4a   :  { %943 = vmatprep.subr.bf16.mxu1 %v1646_v3  ;;  %v1733_v3 = vld [vmem:[#allocation2 + $0x3a4] ss:$8 sps:$4 sm:$0xff]  }
  0x4c   :  { %901 = vmatpush2.bf16.msra.mxu0 %v1648_v4  ;;  %v1728_v4 = vld [vmem:[#allocation2 + $0x2a0] ss:$8 sps:$4 sm:$0xff]  }
  0x4d   :  { %944 = vmatpush2.bf16.msra.mxu1 %v1649_v5  ;;  %956 = vmatprep.subr.bf16.mxu0 %v1652_v6  ;;  %v1731_v5 = vld [vmem:[#allocation2 + $0x3a0] ss:$8 sps:$4 sm:$0xff]   ;;  %v1736_v6 = vld [vmem:[#allocation2 + $0x294] ss:$8 sps:$4 sm:$0xff]  }
  0x4e   :  { %999 = vmatprep.subr.bf16.mxu1 %v1655_v7  ;;  %v1739_v7 = vld [vmem:[#allocation2 + $0x394] ss:$8 sps:$4 sm:$0xff]  }
  0x4f   :  { %903 = vmatmul.mubr.bf16.vlgmr.msra.gmra.mxu0 %v1350_v8  ;;  %v1734_v8 = vld [vmem:[#allocation2 + $0x290] ss:$8 sps:$4 sm:$0xff]  }
  0x50   :  { %946 = vmatmul.mubr.bf16.vlgmr.msra.gmra.mxu1 %v1352_v9  ;;  %957 = vmatpush1.bf16.msra.mxu0 %v1650_v10  ;;  %v1737_v9 = vld [vmem:[#allocation2 + $0x390] ss:$8 sps:$4 sm:$0xff]   ;;  %v1742_v10 = vld [vmem:[#allocation2 + $0x284] ss:$8 sps:$4 sm:$0xff]  }
  0x51   :  { %1000 = vmatpush1.bf16.msra.mxu1 %v1653_v11  ;;  %958 = vmatprep.subr.bf16.mxu0 %v1658_v12  ;;  %v1745_v11 = vld [vmem:[#allocation2 + $0x384] ss:$8 sps:$4 sm:$0xff]   ;;  %v1740_v12 = vld [vmem:[#allocation2 + $0x280] ss:$8 sps:$4 sm:$0xff]  }
  0x52   :  { %1001 = vmatprep.subr.bf16.mxu1 %v1661_v13  ;;  %988 = vmatprep.mubr.bf16.mxu0 %v1355_v42  ;;  %v1743_v13 = vld [vmem:[#allocation2 + $0x380] ss:$8 sps:$4 sm:$0xff]  }
  0x53   :  { %1031 = vmatprep.mubr.bf16.mxu1 %v1357_v43 }
  0x54   :  { %959 = vmatpush1.bf16.msra.mxu0 %v1656_v14  ;;  %v1354_v14 = vcombine.low %v1885_v36, %v1890_v38  ;;  %v178_v38 = vld [vmem:[%s1987_s2] sm:$0x3] }
  0x55   :  { %1002 = vmatpush1.bf16.msra.mxu1 %v1659_v15  ;;  %960 = vmatprep.subr.bf16.mxu0 %v1664_v16  ;;  %v1356_v15 = vcombine.low %v1895_v39, %v1900_v40  ;;  %v1746_v16 = vld [vmem:[%s1988_s3 + $0x78] sm:$0xff]  }
  0x56   :  { %1003 = vmatprep.subr.bf16.mxu1 %v1667_v17  ;;  %v1747_v17 = vld [vmem:[%s1988_s3 + $0x38] sm:$0xff]  }
  0x58   :  { %961 = vmatpush1.bf16.msra.mxu0 %v1662_v18  ;;  %v1748_v18 = vld [vmem:[%s1988_s3 + $0x70] sm:$0xff]  }
  0x59   :  { %1004 = vmatpush1.bf16.msra.mxu1 %v1665_v19  ;;  %962 = vmatprep.subr.bf16.mxu0 %v1670_v20  ;;  %v1749_v19 = vld [vmem:[%s1988_s3 + $0x30] sm:$0xff]   ;;  %v1750_v20 = vld [vmem:[%s1988_s3 + $0x68] sm:$0xff]  }
  0x5a   :  { %1005 = vmatprep.subr.bf16.mxu1 %v1673_v21  ;;  %v1751_v21 = vld [vmem:[%s1988_s3 + $0x28] sm:$0xff]  }
  0x5c   :  { %963 = vmatpush1.bf16.msra.mxu0 %v1668_v22  ;;  %v1752_v22 = vld [vmem:[%s1988_s3 + $0x60] sm:$0xff]  }
  0x5d   :  { %1006 = vmatpush1.bf16.msra.mxu1 %v1671_v23  ;;  %964 = vmatprep.subr.bf16.mxu0 %v1676_v24  ;;  %v1753_v23 = vld [vmem:[%s1988_s3 + $0x20] sm:$0xff]   ;;  %v1754_v24 = vld [vmem:[%s1988_s3 + $0x58] sm:$0xff]  }
  0x5e   :  { %1007 = vmatprep.subr.bf16.mxu1 %v1679_v25  ;;  %v1755_v25 = vld [vmem:[%s1988_s3 + $0x18] sm:$0xff]  }
  0x60   :  { %965 = vmatpush1.bf16.msra.mxu0 %v1674_v26  ;;  %v1756_v26 = vld [vmem:[%s1988_s3 + $0x50] sm:$0xff]  }
  0x61   :  { %1008 = vmatpush1.bf16.msra.mxu1 %v1677_v27  ;;  %966 = vmatprep.subr.bf16.mxu0 %v1682_v28  ;;  %v1757_v27 = vld [vmem:[%s1988_s3 + $0x10] sm:$0xff]   ;;  %v1758_v28 = vld [vmem:[%s1988_s3 + $0x48] sm:$0xff]  }
  0x62   :  { %1009 = vmatprep.subr.bf16.mxu1 %v1685_v29  ;;  %v1759_v29 = vld [vmem:[%s1988_s3 + $0x8] sm:$0xff]  }
  0x64   :  { %967 = vmatpush1.bf16.msra.mxu0 %v1680_v30  ;;  %v1760_v30 = vld [vmem:[%s1988_s3 + $0x40] sm:$0xff]  }
  0x65   :  { %1010 = vmatpush1.bf16.msra.mxu1 %v1683_v31  ;;  %968 = vmatprep.subr.bf16.mxu0 %v1688_v32  ;;  %v1761_v31 = vld [vmem:[%s1988_s3] sm:$0xff]   ;;  %v1821_v32 = vmov 0.0  }
  0x66   :  { %1011 = vmatprep.subr.bf16.mxu1 %v1691_v33  ;;  %v180_v33 = vlaneseq }
  0x68   :  { %969 = vmatpush1.bf16.msra.mxu0 %v1686_v34  ;;  %v181_v34 = vshrl.u32 %v180_v33, 7 }
  0x69   :  { %1012 = vmatpush1.bf16.msra.mxu1 %v1689_v35  ;;  %970 = vmatprep.subr.bf16.mxu0 %v1694_v37 }
  0x6a   :  { %1013 = vmatprep.subr.bf16.mxu1 %v1697_v41  ;;  %v186_v37 = vsub.s32 1, %v181_v34  ;;  %v182_v39 = vsub.s32 0, %v181_v34 }
  0x6c   :  { %971 = vmatpush1.bf16.msra.mxu0 %v1692_v44  ;;  %v187_v42 = vrot.slane %v178_v38, %v186_v37  ;;  %v183_v43 = vrot.slane %v178_v38, %v182_v39 }
  0x6d   :  { %1014 = vmatpush1.bf16.msra.mxu1 %v1695_v45  ;;  %972 = vmatprep.subr.bf16.mxu0 %v1700_v46 }
  0x6e   :  { %1015 = vmatprep.subr.bf16.mxu1 %v1703_v47 }
  0x70   :  { %973 = vmatpush2.bf16.msra.mxu0 %v1698_v48 }
  0x71   :  { %1016 = vmatpush2.bf16.msra.mxu1 %v1701_v49  ;;  %974 = vmatprep.subr.bf16.mxu0 %v1706_v50 }
  0x72   :  { %1017 = vmatprep.subr.bf16.mxu1 %v1709_v51 }
  0x74   :  { %975 = vmatpush2.bf16.msra.mxu0 %v1704_v52 }
  0x75   :  { %1018 = vmatpush2.bf16.msra.mxu1 %v1707_v53  ;;  %976 = vmatprep.subr.bf16.mxu0 %v1712_v54 }
  0x76   :  { %1019 = vmatprep.subr.bf16.mxu1 %v1715_v55 }
  0x78   :  { %977 = vmatpush2.bf16.msra.mxu0 %v1710_v56 }
  0x79   :  { %1020 = vmatpush2.bf16.msra.mxu1 %v1713_v57  ;;  %978 = vmatprep.subr.bf16.mxu0 %v1718_v58 }
  0x7a   :  { %1021 = vmatprep.subr.bf16.mxu1 %v1721_v59 }
  0x7c   :  { %979 = vmatpush2.bf16.msra.mxu0 %v1716_v60 }
  0x7d   :  { %1022 = vmatpush2.bf16.msra.mxu1 %v1719_v61  ;;  %980 = vmatprep.subr.bf16.mxu0 %v1724_v62 }
  0x7e   :  { %1023 = vmatprep.subr.bf16.mxu1 %v1727_v63 }
  0x80   :  { %981 = vmatpush2.bf16.msra.mxu0 %v1722_v0 }
  0x81   :  { %1024 = vmatpush2.bf16.msra.mxu1 %v1725_v1  ;;  %982 = vmatprep.subr.bf16.mxu0 %v1730_v2 }
  0x82   :  { %1025 = vmatprep.subr.bf16.mxu1 %v1733_v3 }
  0x84   :  { %983 = vmatpush2.bf16.msra.mxu0 %v1728_v4 }
  0x85   :  { %1026 = vmatpush2.bf16.msra.mxu1 %v1731_v5  ;;  %984 = vmatprep.subr.bf16.mxu0 %v1736_v6 }
  0x86   :  { %1027 = vmatprep.subr.bf16.mxu1 %v1739_v7 }
  0x88   :  { %985 = vmatpush2.bf16.msra.mxu0 %v1734_v8 }
  0x89   :  { %1028 = vmatpush2.bf16.msra.mxu1 %v1737_v9  ;;  %986 = vmatprep.subr.bf16.mxu0 %v1742_v10 }
  0x8a   :  { %1029 = vmatprep.subr.bf16.mxu1 %v1745_v11 }
  0x8c   :  { %987 = vmatpush2.bf16.msra.mxu0 %v1740_v12 }
  0x8d   :  { %1030 = vmatpush2.bf16.msra.mxu1 %v1743_v13  ;;  %1509 = vmatprep.subr.bf16.mxu0 %v1746_v16  ;;  %v1764_v16 = vld [vmem:[%s1990_s5 + $0x8] sm:$0xff]  }
  0x8e   :  { %1536 = vmatprep.subr.bf16.mxu1 %v1821_v32 }
  0x8f   :  { %989 = vmatmul.mubr.bf16.vlgmr.msra.gmra.mxu0 %v1354_v14  ;;  %v1762_v14 = vld [vmem:[%s1990_s5 + $0x18] sm:$0xff]  }
  0x90   :  { %1032 = vmatmul.mubr.bf16.vlgmr.msra.gmra.mxu1 %v1356_v15  ;;  %1510 = vmatpush3.bf16.msra.mxu0 %v1747_v17  ;;  %v1763_v15 = vld [vmem:[%s1990_s5 + $0x10] sm:$0xff]   ;;  %v1765_v17 = vld [vmem:[%s1990_s5] sm:$0xff]  }
  0x91   :  { %1511 = vmatprep.subr.bf16.mxu0 %v1748_v18  ;;  %1537 = vmatpush3.bf16.msra.mxu1 %v1762_v14 }
  0x92   :  { %1538 = vmatprep.subr.bf16.mxu1 %v1821_v32  ;;  %1544 = vmatprep.mubr.msk.bf16.mxu1 %vm1822_vm0, %v1821_v32 }
  0x94   :  { %1512 = vmatpush3.bf16.msra.mxu0 %v1749_v19 }
  0x95   :  { %1513 = vmatprep.subr.bf16.mxu0 %v1750_v20  ;;  %1539 = vmatpush3.bf16.msra.mxu1 %v1763_v15 }
  0x96   :  { %1540 = vmatprep.subr.bf16.mxu1 %v1821_v32 }
  0x98   :  { %1514 = vmatpush3.bf16.msra.mxu0 %v1751_v21  ;;  %v1486_v21 = vld [vmem:[%s1989_s4] ss:$0 sm:$0xff]  ;;  %s1823_s4 = smov [#allocation5]  }
  0x99   :  { %1515 = vmatprep.subr.bf16.mxu0 %v1752_v22  ;;  %1541 = vmatpush3.bf16.msra.mxu1 %v1764_v16 }
  0x9a   :  { %1542 = vmatprep.subr.bf16.mxu1 %v1821_v32 }
  0x9c   :  { %1516 = vmatpush3.bf16.msra.mxu0 %v1753_v23 }
  0x9d   :  { %1517 = vmatprep.subr.bf16.mxu0 %v1754_v24  ;;  %1543 = vmatpush3.bf16.msra.mxu1 %v1765_v17 }
  0xa0   :  { %1518 = vmatpush3.bf16.msra.mxu0 %v1755_v25 }
  0xa1   :  { %1519 = vmatprep.subr.bf16.mxu0 %v1756_v26 }
  0xa4   :  { %1520 = vmatpush3.bf16.msra.mxu0 %v1757_v27 }
  0xa5   :  { %1521 = vmatprep.subr.bf16.mxu0 %v1758_v28 }
  0xa8   :  { %1522 = vmatpush3.bf16.msra.mxu0 %v1759_v29 }
  0xa9   :  { %1523 = vmatprep.subr.bf16.mxu0 %v1760_v30  ;;  %v1503_v30 = vld [vmem:[%s1991_s6] ss:$0 sm:$0xff]  ;;  %s1338_s6 = sshll.u32 %s1823_s4, 4  ;;  %s1339_s6 = int_to_ptr.vmem [resolvable:$true] %s1338_s6 }
  0xaa   :  { %s1794_s20 = scalar_lea.vmem %s1339_s6, 256  ;;  %p1799_p6 = scmp.lt.s32.totalorder %s1339_s6, %s1339_s6 }
  0xab   :  { %p1795_p5 = scmp.ne.s32.totalorder %s1339_s6, %s1794_s20  ;;  %p1800_p7 = scmp.lt.s32.totalorder %s1794_s20, %s1794_s20 }
  0xac   :  { %1524 = vmatpush3.bf16.msra.mxu0 %v1761_v31 }
  0xad   :  { %p1801_p8 = por %p1800_p7, %p1799_p6 }
  0xaf   :  { %p1802_p9 = pnand %p1801_p8, %p1795_p5 }
 0x10f   :  { %v904_v35 = vpop.f32.mrf.mxu0 }
 0x110   :  { %v947_v36 = vpop.f32.mrf.mxu1  ;;  %v905_v47 = vadd.f32 %v904_v35, %v183_v43 }
 0x111   :  { %v906_v40 = vpop.f32.mrf.mxu0 }
 0x112   :  { %v949_v41 = vpop.f32.mrf.mxu1  ;;  %v907_v46 = vadd.f32 %v906_v40, %v187_v42  ;;  %v948_v55 = vadd.f32 %v947_v36, %v905_v47 }
 0x113   :  { %v908_v44 = vpop.f32.mrf.mxu0 }
 0x114   :  { %v951_v45 = vpop.f32.mrf.mxu1  ;;  %v909_v50 = vadd.f32 %v908_v44, %v183_v43  ;;  %v950_v53 = vadd.f32 %v949_v41, %v907_v46 }
 0x115   :  { %v910_v48 = vpop.f32.mrf.mxu0 }
 0x116   :  { %v953_v49 = vpop.f32.mrf.mxu1  ;;  %v911_v54 = vadd.f32 %v910_v48, %v187_v42  ;;  %v952_v58 = vadd.f32 %v951_v45, %v909_v50 }
 0x118   :  { %v954_v63 = vadd.f32 %v953_v49, %v911_v54 }
 0x14f   :  { %v990_v51 = vpop.f32.mrf.mxu0 }
 0x150   :  { %v1033_v52 = vpop.f32.mrf.mxu1  ;;  %v991_v60 = vadd.f32 %v990_v51, %v948_v55 }
 0x151   :  { %v992_v56 = vpop.f32.mrf.mxu0 }
 0x152   :  { %v1035_v57 = vpop.f32.mrf.mxu1  ;;  %v993_v59 = vadd.f32 %v992_v56, %v950_v53  ;;  %v1034_v5 = vadd.f32 %v1033_v52, %v991_v60 }
 0x153   :  { %v994_v61 = vpop.f32.mrf.mxu0 }
 0x154   :  { %v1037_v62 = vpop.f32.mrf.mxu1  ;;  %v995_v0 = vadd.f32 %v994_v61, %v952_v58  ;;  %v1036_v2 = vadd.f32 %v1035_v57, %v993_v59  ;;  %v1042_v11 = vmax.f32 %v1034_v5, 0.0 }
 0x155   :  { %v996_v1 = vpop.f32.mrf.mxu0 }
 0x156   :  { %v1038_v3 = vadd.f32 %v1037_v62, %v995_v0  ;;  %v997_v4 = vadd.f32 %v996_v1, %v954_v63  ;;  %v1039_v6 = vpop.f32.mrf.mxu1  ;;  %v1043_v9 = vmax.f32 %v1036_v2, 0.0 }
 0x158   :  { %v1040_v7 = vadd.f32 %v1039_v6, %v997_v4  ;;  %v1044_v8 = vmax.f32 %v1038_v3, 0.0 }
 0x15a   :  { %v1045_v10 = vmax.f32 %v1040_v7, 0.0  ;;  %v1046_v13 = vpack.c.bf16 %v1044_v8, %v1042_v11 }
 0x15c   :  { %v1047_v12 = vpack.c.bf16 %v1045_v10, %v1043_v9 }
 0x15e   :  { %1215 = vmatprep.mubr.bf16.mxu0 %v1047_v12 }
 0x15f   :  { %1216 = vmatmul.mubr.bf16.vlgmr.msra.gmra.mxu0 %v1046_v13 }
 0x21f   :  { %v1525_v18 = vpop.f32.mrf.mxu0 }
 0x221   :  { %v1526_v19 = vpop.f32.mrf.mxu0 }
 0x222   :  { %v1527_v20 = vadd.f32 %v1526_v19, %v1525_v18 }
 0x223   :  { %v1528_v22 = vpop.f32.mrf.mxu0 }
 0x224   :  { %v1218_v24 = vadd.f32 %v1527_v20, %v1486_v21 }
 0x225   :  { %v1529_v23 = vpop.f32.mrf.mxu0 }
 0x226   :  { %v1530_v25 = vadd.f32 %v1529_v23, %v1528_v22  ;;  %v1224_v27 = vmax.f32 %v1218_v24, 0.0 }
 0x228   :  { %v1221_v26 = vadd.f32 %v1530_v25, %v1486_v21 }
 0x22a   :  { %v1225_v28 = vmax.f32 %v1221_v26, 0.0 }
 0x22c   :  { %v1226_v29 = vpack.c.bf16 %v1225_v28, %v1224_v27 }
 0x22e   :  { %1545 = vmatmul.mubr.msk.bf16.vlgmr.msra.gmra.mxu1 %vm1266_vm1, %v1226_v29 }
 0x2ee   :  { %v1304_v31 = vpop.f32.mrf.mxu1 }
 0x2ef   :  { %v1305_v32 = vadd.f32 %v1503_v30, %v1304_v31 }
 0x2f0   :  { %v1546_v33 = vpop.f32.mrf.mxu1 }
 0x2f1   :  { %1311 = vmax.xlane.f32.xlu0 %v1305_v32 }
 0x2f2   :  { %v1307_v34 = vpop.f32.mrf.mxu1 }
 0x2f3   :  { %v1308_v35 = vadd.f32 %v1503_v30, %v1307_v34 }
 0x2f4   :  { %v1547_v36 = vpop.f32.mrf.mxu1 }
 0x2f5   :  { %1313 = vmax.xlane.f32.xlu0 %v1308_v35 }
 0x37a   :  { %v1312_v37 = vpop.xlane.xlu0 %1311 }
 0x37b   :  { %v1315_v38 = vsub.f32 %v1305_v32, %v1312_v37 }
 0x37d   :  { %v1317_v39 = vmul.f32 1.442695, %v1315_v38 }
 0x37e   :  { %v1314_v40 = vpop.xlane.xlu0 %1313 }
 0x37f   :  { %v1316_v41 = vsub.f32 %v1308_v35, %v1314_v40  ;;  %1766 = vpow2.f32 %v1317_v39 }
 0x381   :  { %v1319_v42 = vmul.f32 1.442695, %v1316_v41 }
 0x383   :  { %1768 = vpow2.f32 %v1319_v42 }
 0x38c   :  { %v1767_v43 = vpop.eup %1766 }
 0x38d   :  { %1321 = vadd.xlane.f32.xlu1 %v1767_v43 }
 0x390   :  { %v1769_v44 = vpop.eup %1768 }
 0x391   :  { %1323 = vadd.xlane.f32.xlu1 %v1769_v44 }
 0x416   :  { %v1322_v45 = vpop.xlane.xlu1 %1321 }
 0x417   :  { %1770 = vlog2.f32 %v1322_v45 }
 0x41a   :  { %v1324_v46 = vpop.xlane.xlu1 %1323 }
 0x41b   :  { %1772 = vlog2.f32 %v1324_v46 }
 0x424   :  { %v1771_v47 = vpop.eup %1770 }
 0x425   :  { %v1326_v48 = vmul.f32 0.6931472, %v1771_v47 }
 0x427   :  { %v1329_v49 = vsub.f32 %v1315_v38, %v1326_v48 }
 0x428   :  { %v1773_v50 = vpop.eup %1772 }
 0x429   :  { %v1328_v51 = vmul.f32 0.6931472, %v1773_v50  ;;  %1331 = vst [vmem:[#allocation5] sm:$0xff] %v1329_v49 }
 0x42b   :  { %v1330_v52 = vsub.f32 %v1316_v41, %v1328_v51 }
 0x42d   :  { %1332 = vst [vmem:[#allocation5 + $0x8] sm:$0xff] %v1330_v52 }
 0x42e   :  { %1805 = shalt.err (!%p1802_p9)
}
 0x42f   :  { %1344 = dma.vmem_to_hbm [thread:$0]  %s1339_s6, 256, %s1992_s7, [#allocation4], %s1819_s27, %s1819_s27, %s1820_s28  }
 0x430   :  { %1816 = dma.done.wait [#allocation4], 256  }
 0x431   :  { %1817 = vsyncadd [#allocation4], 4294967040 }
 0x432   :  { %1348 = vsyncpa [#allocation3], 1 }
 0x433   :  { %1349 = vsyncpa [#allocation4], 1 }

</bundles_post_ra>
